<compile_context>
chip_gen: v7x
topology: tpu7x:2x2x1
jax: 0.10.0
libtpu: 0.0.40
codegen_flags: <defaults>
</compile_context>

<pallas_src>
import functools

import numpy as np
import jax
import jax.numpy as jnp
from jax.experimental import pallas as pl
from jax.experimental.pallas import tpu as pltpu


def _round_up(n, m):
    return ((n + m - 1) // m) * m


def _rfft_row_matrix(W, Wcp):
    """(W, 2*Wcp) f32: [Re F_W | Im F_W] with only the rfft columns (Wc=W//2+1),
    zero-padded to Wcp (multiple of 8).  Built in f64 on the host for accuracy."""
    Wc = W // 2 + 1
    w = np.arange(W, dtype=np.int64)[:, None]
    v = np.arange(Wc, dtype=np.int64)[None, :]
    ang = (-2.0 * np.pi / W) * ((w * v) % W)
    out = np.zeros((W, 2 * Wcp), np.float32)
    out[:, :Wc] = np.cos(ang)
    out[:, Wcp:Wcp + Wc] = np.sin(ang)
    return jnp.asarray(out)


def _fft_col_matrices(H, Hp):
    """Two (Hp, Hp) f32 matrices: Re / Im of the H-point DFT matrix, zero-embedded
    into Hp x Hp (Hp = H rounded up to 8).  F_H is symmetric, so the same matrix
    serves as F_H^T for the transposed (big-M) column pass."""
    j = np.arange(H, dtype=np.int64)[:, None]
    k = np.arange(H, dtype=np.int64)[None, :]
    ang = (-2.0 * np.pi / H) * ((j * k) % H)
    re = np.zeros((Hp, Hp), np.float32)
    im = np.zeros((Hp, Hp), np.float32)
    re[:H, :H] = np.cos(ang)
    im[:H, :H] = np.sin(ang)
    return jnp.asarray(re), jnp.asarray(im)


def _fft_amp_loss_kernel(x_ref, y_ref, cw_ref, chr_ref, chi_ref, o_ref, *,
                         use_l2, W, Wc, Wcp):
    """One grid step: bt images of x and y -> weighted partial sum of
    f(| |FFT2 x| - |FFT2 y| |) over the rfft half-spectrum.

    x_ref, y_ref : (bt, Hp, W)   input dtype (cast to f32 on the tile)
    cw_ref       : (W, 2*Wcp)    [Re F_W | Im F_W]  (rfft columns, zero-padded)
    chr_ref      : (Hp, Hp)      Re F_H (zero-embedded)
    chi_ref      : (Hp, Hp)      Im F_H (zero-embedded)
    o_ref        : (1,1,1,1)     this step's partial sum
    """
    bt, Hp, _ = x_ref.shape

    cw = cw_ref[...]
    ch_re = chr_ref[...]
    ch_im = chi_ref[...]

    def amplitude_t(v_ref):
        # Cast on the VMEM tile (HBM traffic stays at the input precision).
        x = v_ref[...].astype(jnp.float32)                        # (bt, Hp, W)
        # ---- W pass (rfft): one big-M MXU matmul, re & im fused along N.
        r = jnp.dot(x.reshape(bt * Hp, W), cw,
                    preferred_element_type=jnp.float32)           # (bt*Hp, 2Wcp)
        # ---- single XLU transpose so the H contraction lands on the minor dim.
        t = jnp.swapaxes(r.reshape(bt, Hp, 2 * Wcp), 1, 2)        # (bt, 2Wcp, Hp)
        a = t.reshape(bt * 2 * Wcp, Hp)                           # big-M operand
        # ---- H pass: two big-M matmuls (M = bt*2*Wcp), no F_H broadcast,
        #      no per-image batched matmuls.
        p = jnp.dot(a, ch_re, preferred_element_type=jnp.float32)
        q = jnp.dot(a, ch_im, preferred_element_type=jnp.float32)
        p4 = p.reshape(bt, 2, Wcp, Hp)    # [:,0] <- Yre^T rows, [:,1] <- Yim^T rows
        q4 = q.reshape(bt, 2, Wcp, Hp)
        z_re = p4[:, 0] - q4[:, 1]                                # (bt, Wcp, Hp)
        z_im = q4[:, 0] + p4[:, 1]
        return jnp.sqrt(z_re * z_re + z_im * z_im)                # |FFT| (transposed)

    d = amplitude_t(x_ref) - amplitude_t(y_ref)
    contrib = d * d if use_l2 else jnp.abs(d)                     # (bt, Wcp, Hp)

    # Hermitian (rfft) column weights: DC (v=0) and Nyquist (v=W/2, even W)
    # count once, interior columns twice; padded columns contribute 0 anyway.
    v_idx = jax.lax.broadcasted_iota(jnp.int32, contrib.shape, 1)
    wts = jnp.where(v_idx == 0, 1.0, 2.0)
    if W % 2 == 0:
        wts = jnp.where(v_idx == Wc - 1, 1.0, wts)

    psum = jnp.sum(contrib * wts)
    o_ref[...] = jnp.zeros_like(o_ref) + psum


def fourier_amplitude_loss(inp, target, loss_type="l1"):
    """mean over all elements of f(| |FFT2(inp)| - |FFT2(target)| |);
    f = identity for 'l1' (L1Loss), square for 'l2' (MSELoss)."""
    if loss_type not in ("l1", "l2"):
        raise ValueError("Invalid loss_type. Use 'l1' or 'l2'.")

    x = jnp.asarray(inp)
    y = jnp.asarray(target)
    assert x.shape == y.shape and x.ndim >= 2

    # Keep bf16/fp16/f32 in HBM as-is (kernel casts per-tile); demote anything else.
    def _canon(a):
        if a.dtype in (jnp.dtype(jnp.float32), jnp.dtype(jnp.bfloat16),
                       jnp.dtype(jnp.float16)):
            return a
        return a.astype(jnp.float32)
    x, y = _canon(x), _canon(y)
    if x.dtype != y.dtype:
        x, y = x.astype(jnp.float32), y.astype(jnp.float32)

    H, W = int(x.shape[-2]), int(x.shape[-1])
    B = int(np.prod(x.shape[:-2])) if x.ndim > 2 else 1
    n_elems = B * H * W

    Hp = _round_up(H, 8)                  # merged big-M path is universal
    Wc = W // 2 + 1                       # rfft half-spectrum
    Wcp = _round_up(Wc, 8)

    x = x.reshape(B, H, W)
    y = y.reshape(B, H, W)

    # ---- image-tile size from a realistic, generation-aware VMEM budget ----
    itemsize = x.dtype.itemsize
    try:
        vmem_cap = int(pltpu.get_tpu_info().vmem_capacity_bytes)
    except Exception:                     # pragma: no cover - conservative default
        vmem_cap = 64 * 1024 * 1024       # v7x per-TensorCore size (smallest)
    vmem_limit = min(vmem_cap * 3 // 4, 96 * 1024 * 1024)
    # Double-buffered constant DFT matrices (constant index maps; could be
    # single-buffered with pl.Buffered(1), kept double here for compatibility).
    const_bytes = 2 * (W * 2 * Wcp + 2 * Hp * Hp) * 4
    # Peak per image: 2 double-buffered input tiles + ~10 f32 (Hp, ~W) temps.
    per_img = 2 * 2 * Hp * W * itemsize + 10 * 4 * Hp * max(W, 2 * Wcp)
    budget = max(vmem_limit // 2 - const_bytes, per_img)
    bt_cap = max(1, budget // per_img)

    n_split = 2                           # leading 'parallel' axis -> both v7x cores
    b_half = -(-B // n_split)
    bt = int(min(b_half, bt_cap))
    g2 = -(-b_half // bt)
    b_pad = n_split * g2 * bt

    if b_pad != B:                        # zero images contribute 0 to the sum
        x = jnp.pad(x, ((0, b_pad - B), (0, 0), (0, 0)))
        y = jnp.pad(y, ((0, b_pad - B), (0, 0), (0, 0)))
    if Hp != H:                           # zero rows -> zero spectrum rows -> 0
        x = jnp.pad(x, ((0, 0), (0, Hp - H), (0, 0)))
        y = jnp.pad(y, ((0, 0), (0, Hp - H), (0, 0)))

    cw = _rfft_row_matrix(W, Wcp)                     # (W, 2*Wcp)
    ch_re, ch_im = _fft_col_matrices(H, Hp)           # (Hp, Hp) x 2

    kernel = functools.partial(_fft_amp_loss_kernel,
                               use_l2=(loss_type == "l2"),
                               W=W, Wc=Wc, Wcp=Wcp)

    macs = 2 * b_pad * (Hp * W * 2 * Wcp + 2 * (2 * Wcp) * Hp * Hp)
    cost = pl.CostEstimate(
        flops=int(2 * macs),
        transcendentals=int(2 * b_pad * Wcp * Hp),
        bytes_accessed=int(2 * b_pad * Hp * W * itemsize
                           + (W * 2 * Wcp + 2 * Hp * Hp) * 4
                           + n_split * g2 * 4))

    partials = pl.pallas_call(
        kernel,
        out_shape=jax.ShapeDtypeStruct((n_split, g2, 1, 1), jnp.float32),
        grid=(n_split, g2),
        in_specs=[
            pl.BlockSpec((bt, Hp, W), lambda c, i: (c * g2 + i, 0, 0)),
            pl.BlockSpec((bt, Hp, W), lambda c, i: (c * g2 + i, 0, 0)),
            pl.BlockSpec((W, 2 * Wcp), lambda c, i: (0, 0)),
            pl.BlockSpec((Hp, Hp), lambda c, i: (0, 0)),
            pl.BlockSpec((Hp, Hp), lambda c, i: (0, 0)),
        ],
        out_specs=pl.BlockSpec((1, 1, 1, 1), lambda c, i: (c, i, 0, 0)),
        compiler_params=pltpu.CompilerParams(
            dimension_semantics=("parallel", "arbitrary"),
            vmem_limit_bytes=int(vmem_limit)),
        cost_estimate=cost,
    )(x, y, cw, ch_re, ch_im)

    return jnp.sum(partials) / jnp.float32(n_elems)


if __name__ == "__main__":
    key = jax.random.PRNGKey(0)
    kx, ky = jax.random.split(key)
    # PyTorch-convention NCHW inputs: batch=2, channels=4, 16x16 spatial.
    x = jax.random.normal(kx, (2, 4, 16, 16), jnp.float32)
    y = jax.random.normal(ky, (2, 4, 16, 16), jnp.float32)

    loss_fn = jax.jit(fourier_amplitude_loss, static_argnames=("loss_type",))
    loss = loss_fn(x, y)
    jax.block_until_ready(loss)

    # Reference (host, float64): torch.fft.fftn(dim=(-2,-1)) + abs + L1(mean).
    xn = np.asarray(x, np.float64)
    yn = np.asarray(y, np.float64)
    ref = np.mean(np.abs(np.abs(np.fft.fftn(xn, axes=(-2, -1)))
                         - np.abs(np.fft.fftn(yn, axes=(-2, -1)))))
    assert abs(float(loss) - ref) <= 2e-2 * max(1.0, abs(ref)), (float(loss), ref)
    print("KERNEL_OK")
</pallas_src>

<mosaic_0001>
module attributes {stable_mosaic.version = 11 : i64} {
  func.func @_fft_amp_loss_kernel(%arg0: i32, %arg1: i32, %arg2: memref<4x16x16xf32, #tpu.memory_space<vmem>>, %arg3: memref<4x16x16xf32, #tpu.memory_space<vmem>>, %arg4: memref<16x32xf32, #tpu.memory_space<vmem>>, %arg5: memref<16x16xf32, #tpu.memory_space<vmem>>, %arg6: memref<16x16xf32, #tpu.memory_space<vmem>>, %arg7: memref<1x1x1x1xf32, #tpu.memory_space<vmem>>) attributes {dimension_semantics = [#tpu.dimension_semantics<parallel>, #tpu.dimension_semantics<arbitrary>], iteration_bounds = array<i64: 2, 1>, scalar_prefetch = 0 : i64, scratch_operands = 0 : i64, tpu.core_type = #tpu.core_type<tc>, window_params = [{transform_indices = @transform_0, window_bounds = array<i64: 4, 16, 16>}, {transform_indices = @transform_1, window_bounds = array<i64: 4, 16, 16>}, {pipeline_mode = #tpu.pipeline_mode<synchronous>, transform_indices = @transform_2, window_bounds = array<i64: 16, 32>}, {pipeline_mode = #tpu.pipeline_mode<synchronous>, transform_indices = @transform_3, window_bounds = array<i64: 16, 16>}, {pipeline_mode = #tpu.pipeline_mode<synchronous>, transform_indices = @transform_4, window_bounds = array<i64: 16, 16>}, {transform_indices = @transform_5, window_bounds = array<i64: 1, 1, 1, 1>}]} {
    %c0 = arith.constant 0 : index
    %c0_0 = arith.constant 0 : index
    %0 = vector.load %arg4[%c0, %c0_0] : memref<16x32xf32, #tpu.memory_space<vmem>>, vector<16x32xf32>
    %c0_1 = arith.constant 0 : index
    %c0_2 = arith.constant 0 : index
    %1 = vector.load %arg5[%c0_1, %c0_2] : memref<16x16xf32, #tpu.memory_space<vmem>>, vector<16x16xf32>
    %c0_3 = arith.constant 0 : index
    %c0_4 = arith.constant 0 : index
    %2 = vector.load %arg6[%c0_3, %c0_4] : memref<16x16xf32, #tpu.memory_space<vmem>>, vector<16x16xf32>
    %c0_5 = arith.constant 0 : index
    %c0_6 = arith.constant 0 : index
    %c0_7 = arith.constant 0 : index
    %3 = vector.load %arg2[%c0_5, %c0_6, %c0_7] : memref<4x16x16xf32, #tpu.memory_space<vmem>>, vector<4x16x16xf32>
    %4 = vector.shape_cast %3 : vector<4x16x16xf32> to vector<64x16xf32>
    %cst = arith.constant dense<0.000000e+00> : vector<64x32xf32>
    %5 = tpu.matmul %4, %0, %cst {dimension_numbers = #tpu.dot_dimension_numbers<[1], [0], [0], [1], [0, 0, 1, 1], [], []>} : vector<64x16xf32>, vector<16x32xf32>, vector<64x32xf32> -> vector<64x32xf32>
    %6 = vector.shape_cast %5 : vector<64x32xf32> to vector<4x16x32xf32>
    %7 = tpu.transpose %6, [0, 2, 1] : vector<4x16x32xf32> -> vector<4x32x16xf32>
    %8 = vector.shape_cast %7 : vector<4x32x16xf32> to vector<128x16xf32>
    %cst_8 = arith.constant dense<0.000000e+00> : vector<128x16xf32>
    %9 = tpu.matmul %8, %1, %cst_8 {dimension_numbers = #tpu.dot_dimension_numbers<[1], [0], [0], [1], [0, 0, 1, 1], [], []>} : vector<128x16xf32>, vector<16x16xf32>, vector<128x16xf32> -> vector<128x16xf32>
    %cst_9 = arith.constant dense<0.000000e+00> : vector<128x16xf32>
    %10 = tpu.matmul %8, %2, %cst_9 {dimension_numbers = #tpu.dot_dimension_numbers<[1], [0], [0], [1], [0, 0, 1, 1], [], []>} : vector<128x16xf32>, vector<16x16xf32>, vector<128x16xf32> -> vector<128x16xf32>
    %11 = vector.shape_cast %9 : vector<128x16xf32> to vector<4x2x16x16xf32>
    %12 = vector.shape_cast %10 : vector<128x16xf32> to vector<4x2x16x16xf32>
    %13 = vector.extract_strided_slice %11 {offsets = [0, 0, 0, 0], sizes = [4, 1, 16, 16], strides = [1, 1, 1, 1]} : vector<4x2x16x16xf32> to vector<4x1x16x16xf32>
    %14 = vector.shape_cast %13 : vector<4x1x16x16xf32> to vector<4x16x16xf32>
    %15 = vector.extract_strided_slice %12 {offsets = [0, 1, 0, 0], sizes = [4, 1, 16, 16], strides = [1, 1, 1, 1]} : vector<4x2x16x16xf32> to vector<4x1x16x16xf32>
    %16 = vector.shape_cast %15 : vector<4x1x16x16xf32> to vector<4x16x16xf32>
    %17 = arith.subf %14, %16 : vector<4x16x16xf32>
    %18 = vector.extract_strided_slice %12 {offsets = [0, 0, 0, 0], sizes = [4, 1, 16, 16], strides = [1, 1, 1, 1]} : vector<4x2x16x16xf32> to vector<4x1x16x16xf32>
    %19 = vector.shape_cast %18 : vector<4x1x16x16xf32> to vector<4x16x16xf32>
    %20 = vector.extract_strided_slice %11 {offsets = [0, 1, 0, 0], sizes = [4, 1, 16, 16], strides = [1, 1, 1, 1]} : vector<4x2x16x16xf32> to vector<4x1x16x16xf32>
    %21 = vector.shape_cast %20 : vector<4x1x16x16xf32> to vector<4x16x16xf32>
    %22 = arith.addf %19, %21 : vector<4x16x16xf32>
    %23 = arith.mulf %17, %17 : vector<4x16x16xf32>
    %24 = arith.mulf %22, %22 : vector<4x16x16xf32>
    %25 = arith.addf %23, %24 : vector<4x16x16xf32>
    %26 = math.sqrt %25 : vector<4x16x16xf32>
    %c0_10 = arith.constant 0 : index
    %c0_11 = arith.constant 0 : index
    %c0_12 = arith.constant 0 : index
    %27 = vector.load %arg3[%c0_10, %c0_11, %c0_12] : memref<4x16x16xf32, #tpu.memory_space<vmem>>, vector<4x16x16xf32>
    %28 = vector.shape_cast %27 : vector<4x16x16xf32> to vector<64x16xf32>
    %cst_13 = arith.constant dense<0.000000e+00> : vector<64x32xf32>
    %29 = tpu.matmul %28, %0, %cst_13 {dimension_numbers = #tpu.dot_dimension_numbers<[1], [0], [0], [1], [0, 0, 1, 1], [], []>} : vector<64x16xf32>, vector<16x32xf32>, vector<64x32xf32> -> vector<64x32xf32>
    %30 = vector.shape_cast %29 : vector<64x32xf32> to vector<4x16x32xf32>
    %31 = tpu.transpose %30, [0, 2, 1] : vector<4x16x32xf32> -> vector<4x32x16xf32>
    %32 = vector.shape_cast %31 : vector<4x32x16xf32> to vector<128x16xf32>
    %cst_14 = arith.constant dense<0.000000e+00> : vector<128x16xf32>
    %33 = tpu.matmul %32, %1, %cst_14 {dimension_numbers = #tpu.dot_dimension_numbers<[1], [0], [0], [1], [0, 0, 1, 1], [], []>} : vector<128x16xf32>, vector<16x16xf32>, vector<128x16xf32> -> vector<128x16xf32>
    %cst_15 = arith.constant dense<0.000000e+00> : vector<128x16xf32>
    %34 = tpu.matmul %32, %2, %cst_15 {dimension_numbers = #tpu.dot_dimension_numbers<[1], [0], [0], [1], [0, 0, 1, 1], [], []>} : vector<128x16xf32>, vector<16x16xf32>, vector<128x16xf32> -> vector<128x16xf32>
    %35 = vector.shape_cast %33 : vector<128x16xf32> to vector<4x2x16x16xf32>
    %36 = vector.shape_cast %34 : vector<128x16xf32> to vector<4x2x16x16xf32>
    %37 = vector.extract_strided_slice %35 {offsets = [0, 0, 0, 0], sizes = [4, 1, 16, 16], strides = [1, 1, 1, 1]} : vector<4x2x16x16xf32> to vector<4x1x16x16xf32>
    %38 = vector.shape_cast %37 : vector<4x1x16x16xf32> to vector<4x16x16xf32>
    %39 = vector.extract_strided_slice %36 {offsets = [0, 1, 0, 0], sizes = [4, 1, 16, 16], strides = [1, 1, 1, 1]} : vector<4x2x16x16xf32> to vector<4x1x16x16xf32>
    %40 = vector.shape_cast %39 : vector<4x1x16x16xf32> to vector<4x16x16xf32>
    %41 = arith.subf %38, %40 : vector<4x16x16xf32>
    %42 = vector.extract_strided_slice %36 {offsets = [0, 0, 0, 0], sizes = [4, 1, 16, 16], strides = [1, 1, 1, 1]} : vector<4x2x16x16xf32> to vector<4x1x16x16xf32>
    %43 = vector.shape_cast %42 : vector<4x1x16x16xf32> to vector<4x16x16xf32>
    %44 = vector.extract_strided_slice %35 {offsets = [0, 1, 0, 0], sizes = [4, 1, 16, 16], strides = [1, 1, 1, 1]} : vector<4x2x16x16xf32> to vector<4x1x16x16xf32>
    %45 = vector.shape_cast %44 : vector<4x1x16x16xf32> to vector<4x16x16xf32>
    %46 = arith.addf %43, %45 : vector<4x16x16xf32>
    %47 = arith.mulf %41, %41 : vector<4x16x16xf32>
    %48 = arith.mulf %46, %46 : vector<4x16x16xf32>
    %49 = arith.addf %47, %48 : vector<4x16x16xf32>
    %50 = math.sqrt %49 : vector<4x16x16xf32>
    %51 = arith.subf %26, %50 : vector<4x16x16xf32>
    %52 = math.absf %51 : vector<4x16x16xf32>
    %53 = tpu.iota {dimensions = array<i32: 1>} : vector<4x16x16xi32>
    %c0_i32 = arith.constant 0 : i32
    %54 = vector.broadcast %c0_i32 : i32 to vector<4x16x16xi32>
    %55 = arith.cmpi eq, %53, %54 : vector<4x16x16xi32>
    %cst_16 = arith.constant 1.000000e+00 : f32
    %cst_17 = arith.constant 2.000000e+00 : f32
    %56 = vector.broadcast %cst_16 : f32 to vector<4x16x16xf32>
    %57 = vector.broadcast %cst_17 : f32 to vector<4x16x16xf32>
    %58 = arith.select %55, %56, %57 : vector<4x16x16xi1>, vector<4x16x16xf32>
    %c8_i32 = arith.constant 8 : i32
    %59 = vector.broadcast %c8_i32 : i32 to vector<4x16x16xi32>
    %60 = arith.cmpi eq, %53, %59 : vector<4x16x16xi32>
    %cst_18 = arith.constant 1.000000e+00 : f32
    %61 = vector.broadcast %cst_18 : f32 to vector<4x16x16xf32>
    %62 = arith.select %60, %61, %58 : vector<4x16x16xi1>, vector<4x16x16xf32>
    %63 = arith.mulf %52, %62 : vector<4x16x16xf32>
    %64 = vector.shape_cast %63 : vector<4x16x16xf32> to vector<1x4x16x16xf32>
    %cst_19 = arith.constant dense<0.000000e+00> : vector<1xf32>
    %65 = vector.multi_reduction <add>, %64, %cst_19 [1, 2, 3] : vector<1x4x16x16xf32> to vector<1xf32>
    %66 = vector.shape_cast %65 : vector<1xf32> to vector<1x1x1x1xf32>
    %67 = vector.extract %66[0, 0, 0, 0] : f32 from vector<1x1x1x1xf32>
    %cst_20 = arith.constant 0.000000e+00 : f32
    %68 = vector.broadcast %cst_20 : f32 to vector<1x1x1x1xf32>
    %69 = vector.broadcast %67 : f32 to vector<1x1x1x1xf32>
    %70 = arith.addf %68, %69 : vector<1x1x1x1xf32>
    %c0_21 = arith.constant 0 : index
    %c0_22 = arith.constant 0 : index
    %c0_23 = arith.constant 0 : index
    %c0_24 = arith.constant 0 : index
    %71 = vector.load %arg7[%c0_21, %c0_22, %c0_23, %c0_24] : memref<1x1x1x1xf32, #tpu.memory_space<vmem>>, vector<1x1x1x1xf32>
    tpu.vector_store %arg7[%c0_21, %c0_22, %c0_23, %c0_24], %70 {strides = array<i32>} : memref<1x1x1x1xf32, #tpu.memory_space<vmem>>, vector<1x1x1x1xf32>,
    return
  }
  func.func @transform_0(%arg0: i32, %arg1: i32) -> (i32, i32, i32) {
    %c1_i32 = arith.constant 1 : i32
    %0 = arith.muli %arg0, %c1_i32 : i32
    %1 = arith.addi %0, %arg1 : i32
    %c0_i32 = arith.constant 0 : i32
    %c0_i32_0 = arith.constant 0 : i32
    %c0_i32_1 = arith.constant 0 : i32
    return %1, %c0_i32, %c0_i32_0 : i32, i32, i32
  }
  func.func @transform_1(%arg0: i32, %arg1: i32) -> (i32, i32, i32) {
    %c1_i32 = arith.constant 1 : i32
    %0 = arith.muli %arg0, %c1_i32 : i32
    %1 = arith.addi %0, %arg1 : i32
    %c0_i32 = arith.constant 0 : i32
    %c0_i32_0 = arith.constant 0 : i32
    %c0_i32_1 = arith.constant 0 : i32
    return %1, %c0_i32, %c0_i32_0 : i32, i32, i32
  }
  func.func @transform_2(%arg0: i32, %arg1: i32) -> (i32, i32) {
    %c0_i32 = arith.constant 0 : i32
    %c0_i32_0 = arith.constant 0 : i32
    %c0_i32_1 = arith.constant 0 : i32
    return %c0_i32, %c0_i32_0 : i32, i32
  }
  func.func @transform_3(%arg0: i32, %arg1: i32) -> (i32, i32) {
    %c0_i32 = arith.constant 0 : i32
    %c0_i32_0 = arith.constant 0 : i32
    %c0_i32_1 = arith.constant 0 : i32
    return %c0_i32, %c0_i32_0 : i32, i32
  }
  func.func @transform_4(%arg0: i32, %arg1: i32) -> (i32, i32) {
    %c0_i32 = arith.constant 0 : i32
    %c0_i32_0 = arith.constant 0 : i32
    %c0_i32_1 = arith.constant 0 : i32
    return %c0_i32, %c0_i32_0 : i32, i32
  }
  func.func @transform_5(%arg0: i32, %arg1: i32) -> (i32, i32, i32, i32) {
    %c0_i32 = arith.constant 0 : i32
    %c0_i32_0 = arith.constant 0 : i32
    %c0_i32_1 = arith.constant 0 : i32
    return %arg0, %arg1, %c0_i32, %c0_i32_0 : i32, i32, i32, i32
  }
}

</mosaic_0001>

<bundles_post_ra>
// kernel: fourier_amplitude_loss.1
= control target key start
LH: loop header
LB: loop body
LE: loop exit
PB: predicated region body
PF: predicated region fallthrough
CT: control target
= control target key end

     0   :  { %s3275_s0 = inlined_call_operand.hbm [shape: f32[8,16,16], index: 0, kind: input, shape index: {}]   ;;  %s3276_s1 = inlined_call_operand.hbm [shape: f32[8,16,16], index: 1, kind: input, shape index: {}]   ;;  %s3277_s2 = inlined_call_operand.hbm [shape: f32[16,32], index: 2, kind: input, shape index: {}]   ;;  %s3278_s3 = inlined_call_operand.hbm [shape: f32[16,16], index: 3, kind: input, shape index: {}]   ;;  %s3279_s4 = inlined_call_operand.vmem [shape: f32[16,16], index: 4, kind: input, shape index: {}]   ;;  %s3280_s5 = inlined_call_operand.vmem [shape: f32[2,1,1,1], index: 5, kind: output, shape index: {}]  }
   0x1   :  { %3290 = sst [smem:[#allocation13_spill]] %s3275_s0 }
   0x2   :  { %10 = vsyncpa [#allocation3], 0 }
   0x3   :  { %12 = vsyncpa [#allocation3 + $0x1], 0 }
   0x4   :  { %13 = vsyncpa [#allocation5], 0 }
   0x5   :  { %15 = vsyncpa [#allocation5 + $0x1], 0 }
   0x6   :  { %16 = vsyncpa [#allocation8], 0  ;;  %s2648_s18 = smov 0   ;;  %s2650_s19 = smov 0  }
   0x7   :  { %s2652_s20 = smov 0   ;;  %s2654_s21 = smov 0  }
   0x8   :  { %s2656_s22 = smov 0   ;;  %s2658_s23 = smov 0  }
   0x9 LB: > { %s3285_s24 = sadd.s32 4294967295, %s2609_s23   ;;  %p56_p0 = scmp.ne.s32.totalorder %s2593_s19, %s2589_s18  ;;  %s2609_s23 = sphi %s2658_s23, %s22_s23   ;;  %s2605_s22 = sphi %s2656_s22, %s3308_s22   ;;  %s2601_s21 = sphi %s2654_s21, %s3307_s21   ;;  %s2597_s20 = sphi %s2652_s20, %s3306_s20   ;;  %s2593_s19 = sphi %s2650_s19, %s3305_s19   ;;  %s2589_s18 = sphi %s2648_s18, %s3304_s18  }
   0xa   : > { %p2680_p1 = scmp.eq.s32.totalorder %s3285_s24, 0  ;;  %p1933_p2 = scmp.ge.s32.totalorder %s2609_s23, 1 }
   0xb   : > { %p186_p3 = scmp.lt.s32.totalorder %s2609_s23, 3  ;;  %s2611_s28 = smov [#allocation6]  }
   0xc   : > { %s3291_s25 = scalar_select %p2680_p1, 1, 0 }
   0xd   : > { %p2688_p4 = por %p2680_p1, %p56_p0  ;;  %p2692_p5 = pnand %p1933_p2, %p186_p3 }
   0xe   : > { %s198_s29 = sshll.u32 %s2611_s28, 4  ;;  %s2612_s6 = smov [#allocation7]   ;;  %s199_s29 = int_to_ptr.vmem [resolvable:$true] %s198_s29 }
   0xf   : > { %s3292_s26 = scalar_select %p2688_p4, 1, 0 }
  0x10   : > { %s3293_s27 = scalar_select %p2692_p5, 1, 0 }
  0x11   : > { %p2326_p6 = pneg %p2692_p5  ;;  %s211_s7 = sshll.u32 %s2612_s6, 4  ;;  %s2704_s7 = int_to_ptr.vmem [resolvable:$true] %s211_s7 }
  0x12   : > { %s2431_s10 = scalar_lea.hbm %s3277_s2, 256 }
  0x13   : > { %p2700_p7 = pnand %p2326_p6, %p2680_p1  ;;  %p2432_p8 = scmp.ne.s32.totalorder %s3277_s2, %s2431_s10 }
  0x14   : > { %p2438_p12 = scmp.lt.u32.totalorder %s2431_s10, %s3277_s2 }
  0x15   : > { %p2433_p9 = pneg %p2700_p7 }
  0x17   : > { %p2434_p10 = pnand %p2433_p9, %p2432_p8 }
  0x19   : > { %p2435_p11 = pneg %p2434_p10 }
  0x1b   : > { %p2440_p13 = pnand %p2438_p12, %p2435_p11 }
  0x1d   : > { %2443 = shalt.err (!%p2440_p13)
}
  0x1e   : > { %s2444_s15 = scalar_lea.vmem %s199_s29, 256  ;;  %p2452_p6 = scmp.lt.s32.totalorder %s199_s29, %s199_s29 }
  0x1f   : > { %p2445_p0 = scmp.ne.s32.totalorder %s199_s29, %s2444_s15  ;;  %p2453_p1 = scmp.lt.s32.totalorder %s2444_s15, %s2444_s15 }
  0x21   : > { %p2447_p2 = pnand %p2445_p0, %p2433_p9  ;;  %p2454_p4 = por %p2453_p1, %p2452_p6 }
  0x23   : > { %p2448_p3 = pneg %p2447_p2 }
  0x25   : > { %p2455_p5 = pnand %p2454_p4, %p2448_p3 }
  0x27   : > { %2458 = shalt.err (!%p2455_p5)
}
  0x28   : > { %s3286_s16 = smov 128   ;;  %s3288_s17 = smov 8  }
  0x29   : > { %2329 = dma.hbm_to_vmem [thread:$0]  (!%p2700_p7), %s3277_s2, 256, %s199_s29, [#allocation5], %s3286_s16, %s3286_s16, %s3288_s17  }
  0x2a   : > { %s2459_s9 = scalar_lea.hbm %s3278_s3, 256 }
  0x2b   : > { %p2460_p1 = scmp.ne.s32.totalorder %s3278_s3, %s2459_s9  ;;  %p2466_p8 = scmp.lt.u32.totalorder %s2459_s9, %s3278_s3 }
  0x2d   : > { %p2462_p4 = pnand %p2460_p1, %p2433_p9 }
  0x2f   : > { %p2463_p5 = pneg %p2462_p4 }
  0x31   : > { %p2468_p10 = pnand %p2466_p8, %p2463_p5 }
  0x33   : > { %2471 = shalt.err (!%p2468_p10)
}
  0x34   : > { %s2472_s29 = scalar_lea.vmem %s2704_s7, 256  ;;  %p2480_p0 = scmp.lt.s32.totalorder %s2704_s7, %s2704_s7 }
  0x35   : > { %p2473_p11 = scmp.ne.s32.totalorder %s2704_s7, %s2472_s29  ;;  %p2481_p2 = scmp.lt.s32.totalorder %s2472_s29, %s2472_s29 }
  0x37   : > { %p2475_p12 = pnand %p2473_p11, %p2433_p9  ;;  %p2482_p3 = por %p2481_p2, %p2480_p0 }
  0x39   : > { %p2476_p13 = pneg %p2475_p12 }
  0x3b   : > { %p2483_p6 = pnand %p2482_p3, %p2476_p13 }
  0x3d   : > { %2486 = shalt.err (!%p2483_p6)
}
  0x3e   : > { %2332 = dma.hbm_to_vmem [thread:$0]  (!%p2700_p7), %s3278_s3, 256, %s2704_s7, [#allocation8], %s3286_s16, %s3286_s16, %s3288_s17  }
  0x3f   : > { %s34_s18 = sadd.s32 1, %s2605_s22  ;;  %s43_s30 = sadd.s32 1, %s2597_s20 }
  0x40   : > { %p36_p9 = scmp.ge.s32.totalorder %s34_s18, 2  ;;  %p50_p1 = scmp.ne.s32.totalorder %s2597_s20, %s2593_s19 }
  0x41   : > { %p51_p4 = scmp.eq.s32.totalorder %s2609_s23, 0  ;;  %p2342_p5 = scmp.lt.s32.totalorder %s2609_s23, 2 }
  0x42   : > { %s3310_s18 = smov (%p36_p9, %s34_s18), 0  ;;  %s228_s28 = sand.u32 1, %s2597_s20  }
  0x43   : > { %p52_p8 = por %p51_p4, %p50_p1  ;;  %s40_s6 = ssub.s32 %s2605_s22, %s3310_s18 }
  0x44   : > { %p41_p10 = scmp.eq.s32.totalorder %s40_s6, 0  ;;  %s1937_s8 = sshll.u32 %s228_s28, 6 }
  0x45   : > { %s2033_s9 = sshll.u32 %s2605_s22, 10  ;;  %s3295_s0 = sld [smem:[#allocation13_spill]] }
  0x46   : > { %s2772_s10 = scalar_select %p41_p10, %s2597_s20, %s43_s30  }
  0x47   : > { %s232_s13 = scalar_lea.vmem [#allocation2], %s1937_s8  ;;  %p2783_p7 = pnand %p2342_p5, %p52_p8 }
  0x48   : > { %s241_s29 = sshll.u32 %s232_s13, 4  ;;  %s2790_s6 = scalar_lea.hbm %s3276_s1, %s2033_s9  ;;  %s2779_s29 = int_to_ptr.vmem [resolvable:$true] %s241_s29 }
  0x49   : > { %s255_s11 = scalar_lea.vmem [#allocation4], %s1937_s8  ;;  %s2794_s24 = scalar_lea.sflag [#allocation3], %s228_s28 }
  0x4a   : > { %s2792_s7 = sshll.u32 %s255_s11, 4  ;;  %p2489_p12 = pneg %p2783_p7  ;;  %s2826_s7 = int_to_ptr.vmem [resolvable:$true] %s2792_s7 }
  0x4b   : > { %s2777_s12 = scalar_lea.hbm %s3295_s0, %s2033_s9  ;;  %s2492_s15 = scalar_lea.hbm %s3295_s0, 2048 }
  0x4c   : > { %s2487_s13 = scalar_lea.hbm %s2777_s12, 1024  ;;  %p2493_p2 = scmp.lt.u32.totalorder %s2777_s12, %s3295_s0 }
  0x4d   : > { %p2488_p11 = scmp.ne.s32.totalorder %s2777_s12, %s2487_s13  ;;  %p2494_p3 = scmp.lt.u32.totalorder %s2492_s15, %s2487_s13 }
  0x4e   : > { %p2496_p9 = scmp.lt.u32.totalorder %s2487_s13, %s2777_s12 }
  0x4f   : > { %p2490_p13 = pnand %p2489_p12, %p2488_p11  ;;  %p2495_p6 = por %p2494_p3, %p2493_p2 }
  0x51   : > { %p2491_p0 = pneg %p2490_p13  ;;  %p2497_p1 = por %p2496_p9, %p2495_p6 }
  0x53   : > { %p2498_p4 = pnand %p2497_p1, %p2491_p0 }
  0x55   : > { %2501 = shalt.err (!%p2498_p4)
}
  0x56   : > { %s2502_s28 = scalar_lea.vmem %s2779_s29, 1024  ;;  %s2615_s16 = smov [#allocation2]  }
  0x57   : > { %p2503_p5 = scmp.ne.s32.totalorder %s2779_s29, %s2502_s28  ;;  %s2507_s17 = sshll.u32 %s2615_s16, 4  ;;  %s2508_s17 = int_to_ptr.vmem [resolvable:$false] %s2507_s17 }
  0x58   : > { %s2509_s8 = scalar_lea.vmem %s2508_s17, 2048  ;;  %p2510_p11 = scmp.lt.s32.totalorder %s2779_s29, %s2508_s17 }
  0x59   : > { %p2505_p8 = pnand %p2503_p5, %p2489_p12  ;;  %p2511_p13 = scmp.lt.s32.totalorder %s2509_s8, %s2502_s28 }
  0x5b   : > { %p2506_p10 = pneg %p2505_p8  ;;  %p2512_p2 = por %p2511_p13, %p2510_p11 }
  0x5d   : > { %p2513_p3 = pnand %p2512_p2, %p2506_p10 }
  0x5f   : > { %2516 = shalt.err (!%p2513_p3)
}
  0x60   : > { %s3297_s11 = smov 8   ;;  %s3298_s13 = smov 128  }
  0x61   : > { %2336 = dma.hbm_to_vmem [thread:$0]  (!%p2783_p7), %s2777_s12, 1024, %s2779_s29, %s2794_s24, %s3298_s13, %s3298_s13, %s3297_s11  }
  0x62   : > { %s251_s15 = sand.u32 1, %s2609_s23   ;;  %s2517_s9 = scalar_lea.hbm %s2790_s6, 1024 }
  0x63   : > { %s2829_s30 = scalar_lea.sflag [#allocation5], %s251_s15  ;;  %p2518_p0 = scmp.ne.s32.totalorder %s2790_s6, %s2517_s9 }
  0x64   : > { %s2522_s17 = scalar_lea.hbm %s3276_s1, 2048  ;;  %p2523_p1 = scmp.lt.u32.totalorder %s2790_s6, %s3276_s1 }
  0x65   : > { %p2520_p6 = pnand %p2518_p0, %p2489_p12  ;;  %p2524_p4 = scmp.lt.u32.totalorder %s2522_s17, %s2517_s9 }
  0x66   : > { %p2526_p8 = scmp.lt.u32.totalorder %s2517_s9, %s2790_s6 }
  0x67   : > { %p2521_p9 = pneg %p2520_p6  ;;  %p2525_p5 = por %p2524_p4, %p2523_p1 }
  0x69   : > { %p2527_p10 = por %p2526_p8, %p2525_p5 }
  0x6b   : > { %p2528_p11 = pnand %p2527_p10, %p2521_p9 }
  0x6d   : > { %2531 = shalt.err (!%p2528_p11)
}
  0x6e   : > { %s2532_s24 = scalar_lea.vmem %s2826_s7, 1024  ;;  %s2616_s12 = smov [#allocation4]  }
  0x6f   : > { %p2533_p13 = scmp.ne.s32.totalorder %s2826_s7, %s2532_s24  ;;  %s2537_s29 = sshll.u32 %s2616_s12, 4  ;;  %s2538_s29 = int_to_ptr.vmem [resolvable:$false] %s2537_s29 }
  0x70   : > { %s2539_s0 = scalar_lea.vmem %s2538_s29, 2048  ;;  %p2540_p0 = scmp.lt.s32.totalorder %s2826_s7, %s2538_s29 }
  0x71   : > { %p2535_p2 = pnand %p2533_p13, %p2489_p12  ;;  %p2541_p6 = scmp.lt.s32.totalorder %s2539_s0, %s2532_s24 }
  0x73   : > { %p2536_p3 = pneg %p2535_p2  ;;  %p2542_p1 = por %p2541_p6, %p2540_p0 }
  0x75   : > { %p2543_p4 = pnand %p2542_p1, %p2536_p3 }
  0x77   : > { %2546 = shalt.err (!%p2543_p4)
}
  0x78   : > { %2339 = dma.hbm_to_vmem [thread:$0]  (!%p2783_p7), %s2790_s6, 1024, %s2826_s7, %s2829_s30, %s3298_s13, %s3298_s13, %s3297_s11  }
  0x79   : > { %p3299_p12 = scmp.ne.s32.totalorder %s3293_s27, 0 }
  0x7a   : > { %s278_s15 = sand.u32 (!%p3299_p12), 1, %s2593_s19   ;;  %p3300_p9 = scmp.ne.s32.totalorder (!%p3299_p12), %s3292_s26, 0 }
  0x7b   : > { %276 = sbr.rel (%p3299_p12) target bundleno = 1042 (0x412), region = 40  ;;  %s1946_s9 = sshll.u32 (!%p3299_p12), %s278_s15, 6 }
  0x7c   : > { %s279_s28 = scalar_lea.sflag (!%p3299_p12), [#allocation3], %s278_s15  ;;  %s2861_s16 = scalar_lea.vmem (!%p3299_p12), [#allocation2], %s1946_s9 }
  0x82   : > { %2572 = dma.done.wait (%p3300_p9), %s279_s28, 1024  }
  0x83   : > { %2574 = vsyncadd (%p3300_p9), %s279_s28, 4294966272  ;;  %s3301_s14 = sadd.s32 4294967295, %s2609_s23   ;;  %s2869_s7 = scalar_lea.vmem [#allocation4], %s1946_s9 }
  0x84   : > { %s287_s17 = sand.u32 1, %s3301_s14  }
  0x85   : > { %s288_s6 = scalar_lea.sflag [#allocation5], %s287_s17 }
  0x86   : > { %2576 = dma.done.wait (%p3300_p9), %s288_s6, 1024  }
  0x87   : > { %2578 = vsyncadd (%p3300_p9), %s288_s6, 4294966272  ;;  %p3302_p7 = scmp.ne.s32.totalorder %s3291_s25, 0 }
  0x89   : > { %2580 = dma.done.wait (%p3302_p7), [#allocation5], 256  }
  0x8a   : > { %2582 = vsyncadd (%p3302_p7), [#allocation5], 4294967040 }
  0x8b   : > { %2584 = dma.done.wait (%p3302_p7), [#allocation8], 256  }
  0x8c   : > { %2586 = vsyncadd (%p3302_p7), [#allocation8], 4294967040  ;;  %vm356_vm0 = vcmask 130048   ;;  %v342_v0 = vld [vmem:[#allocation6] sm:$0xff]  ;;  %v343_v1 = vld [vmem:[#allocation6 + $0x8] sm:$0xff]  ;;  %p336_p5 = scmp.lt.s32.totalorder %s2601_s21, 1 }
  0x8d   : > { %v348_v2 = vld [vmem:[%s2861_s16] sm:$0xff]  ;;  %v2272_v3 = vpack.c.bf16 %v343_v1, %v342_v0  ;;  %v349_v5 = vld [vmem:[%s2861_s16 + $0x8] sm:$0xff]  ;;  %v350_v7 = vld [vmem:[%s2861_s16 + $0x10] sm:$0xff] }
  0x8e   : > { %2132 = vmatprep.mubr.msk.f32.mxu1 %vm356_vm0, %v348_v2  ;;  %v1048_v4 = vld [vmem:[%s2869_s7] sm:$0xff]  ;;  %v1049_v6 = vld [vmem:[%s2869_s7 + $0x8] sm:$0xff]  ;;  %v1050_v8 = vld [vmem:[%s2869_s7 + $0x10] sm:$0xff]  ;;  %s3312_s21 = smov (!%p336_p5, %s2601_s21), 1 }
  0x8f   : > { %2204 = vmatprep.mubr.msk.f32.mxu0 %vm356_vm0, %v1048_v4  ;;  %2273 = vmatprep.subr.bf16.mxu1 %v2272_v3  ;;  %v351_v9 = vld [vmem:[%s2861_s16 + $0x18] sm:$0xff]  ;;  %v352_v11 = vld [vmem:[%s2861_s16 + $0x20] sm:$0xff]  ;;  %v353_v13 = vld [vmem:[%s2861_s16 + $0x28] sm:$0xff]  ;;  %s341_s8 = scalar_lea.vmem %s3280_s5, %s3312_s21 }
  0x90   : > { %2285 = vmatprep.subr.bf16.mxu0 %v2272_v3  ;;  %2275 = vmatpush3.bf16.msra.mxu1 %v2272_v3  ;;  %v1051_v10 = vld [vmem:[%s2869_s7 + $0x18] sm:$0xff]  ;;  %v1052_v12 = vld [vmem:[%s2869_s7 + $0x20] sm:$0xff]  ;;  %v1053_v14 = vld [vmem:[%s2869_s7 + $0x28] sm:$0xff] }
  0x91   : > { %2287 = vmatpush3.bf16.msra.mxu0 %v2272_v3  ;;  %v354_v15 = vld [vmem:[%s2861_s16 + $0x30] sm:$0xff]  ;;  %v355_v17 = vld [vmem:[%s2861_s16 + $0x38] sm:$0xff]  ;;  %v346_v38 = vld [vmem:[%s3279_s4] sm:$0xff] }
  0x92   : > { %v1054_v16 = vld [vmem:[%s2869_s7 + $0x30] sm:$0xff]  ;;  %v1055_v18 = vld [vmem:[%s2869_s7 + $0x38] sm:$0xff]  ;;  %v347_v39 = vld [vmem:[%s3279_s4 + $0x8] sm:$0xff] }
  0x93   : > { %2133 = vmatmul.mubr.msk.f32.vlgmr.msra.gmra.mrb[0].mxu1 %vm356_vm0, %v349_v5  ;;  %v344_v21 = vld [vmem:[#allocation7] sm:$0xff]  ;;  %v345_v22 = vld [vmem:[#allocation7 + $0x8] sm:$0xff]  ;;  %v2280_v40 = vpack.c.bf16 %v347_v39, %v346_v38 }
  0x94   : > { %2205 = vmatmul.mubr.msk.f32.vlgmr.msra.gmra.mrb[0].mxu0 %vm356_vm0, %v1049_v6  ;;  %2135 = vmatprep.mubr.msk.f32.mxu1 %vm356_vm0, %v350_v7  ;;  %v2276_v25 = vpack.c.bf16 %v345_v22, %v344_v21 }
  0x95   : > { %2207 = vmatprep.mubr.msk.f32.mxu0 %vm356_vm0, %v1050_v8 }
  0x96   : > { %2277 = vmatprep.subr.bf16.mxu1 %v2276_v25  ;;  %2289 = vmatprep.subr.bf16.mxu0 %v2276_v25 }
  0x97   : > { %2136 = vmatmul.mubr.msk.f32.gmra.mrb[2].mxu1 %vm356_vm0, %v351_v9  ;;  %2291 = vmatpush3.bf16.msra.mxu0 %v2276_v25 }
  0x98   : > { %2208 = vmatmul.mubr.msk.f32.gmra.mrb[2].mxu0 %vm356_vm0, %v1051_v10  ;;  %2138 = vmatprep.mubr.msk.f32.mxu1 %vm356_vm0, %v352_v11 }
  0x99   : > { %2210 = vmatprep.mubr.msk.f32.mxu0 %vm356_vm0, %v1052_v12  ;;  %2279 = vmatpush3.bf16.msra.mxu1 %v2276_v25 }
  0x9a   : > { %2293 = vmatprep.subr.bf16.mxu0 %v2280_v40  ;;  %2281 = vmatprep.subr.bf16.mxu1 %v2280_v40 }
  0x9b   : > { %2139 = vmatmul.mubr.msk.f32.gmra.mrb[4].mxu1 %vm356_vm0, %v353_v13 }
  0x9c   : > { %2211 = vmatmul.mubr.msk.f32.gmra.mrb[4].mxu0 %vm356_vm0, %v1053_v14  ;;  %2141 = vmatprep.mubr.msk.f32.mxu1 %vm356_vm0, %v354_v15 }
  0x9d   : > { %2213 = vmatprep.mubr.msk.f32.mxu0 %vm356_vm0, %v1054_v16 }
  0x9f   : > { %2142 = vmatmul.mubr.msk.f32.gmra.mrb[6].mxu1 %vm356_vm0, %v355_v17 }
  0xa0   : > { %2214 = vmatmul.mubr.msk.f32.gmra.mrb[6].mxu0 %vm356_vm0, %v1055_v18 }
 0x166   : > { %v2134_v19 = vpop.f32.mrb[0].mxu1 }
 0x167   : > { %v2206_v20 = vpop.f32.mrb[0].mxu0  ;;  %v447_v23 = vpop.f32.mrb[1].mxu1 }
 0x168   : > { %v1146_v24 = vpop.f32.mrb[1].mxu0  ;;  %486 = vxpose.xlu0.b32.start [1/2] (short) (narrow) %v447_v23, 32 }
 0x169   : > { %1185 = vxpose.xlu1.b32.start [1/2] (short) (narrow) %v1146_v24, 32 }
 0x16a   : > { %v2137_v26 = vpop.f32.mrb[2].mxu1 }
 0x16b   : > { %v2209_v27 = vpop.f32.mrb[2].mxu0  ;;  %v457_v28 = vpop.f32.mrb[3].mxu1 }
 0x16c   : > { %v1156_v29 = vpop.f32.mrb[3].mxu0  ;;  %487 = vxpose.xlu0.b32.end [2/2] (short) (narrow) %v2134_v19, 32 }
 0x16d   : > { %1186 = vxpose.xlu1.b32.end [2/2] (short) (narrow) %v2206_v20, 32 }
 0x16e   : > { %v2140_v30 = vpop.f32.mrb[4].mxu1 }
 0x16f   : > { %v2212_v31 = vpop.f32.mrb[4].mxu0  ;;  %v467_v32 = vpop.f32.mrb[5].mxu1 }
 0x170   : > { %v1166_v33 = vpop.f32.mrb[5].mxu0 }
 0x172   : > { %v2143_v34 = vpop.f32.mrb[6].mxu1 }
 0x173   : > { %v2215_v35 = vpop.f32.mrb[6].mxu0  ;;  %v477_v36 = vpop.f32.mrb[7].mxu1 }
 0x174   : > { %v1176_v37 = vpop.f32.mrb[7].mxu0 }
 0x175   : > { %518 = vxpose.xlu0.b32.start [1/2] (short) (narrow) %v457_v28, 32 }
 0x176   : > { %1217 = vxpose.xlu1.b32.start [1/2] (short) (narrow) %v1156_v29, 32  ;;  %v1763_v29 = vlaneseq }
 0x179   : > { %519 = vxpose.xlu0.b32.end [2/2] (short) (narrow) %v2137_v26, 32 }
 0x17a   : > { %1218 = vxpose.xlu1.b32.end [2/2] (short) (narrow) %v2209_v27, 32 }
 0x182   : > { %550 = vxpose.xlu0.b32.start [1/2] (short) (narrow) %v467_v32, 32 }
 0x183   : > { %1249 = vxpose.xlu1.b32.start [1/2] (short) (narrow) %v1166_v33, 32 }
 0x186   : > { %551 = vxpose.xlu0.b32.end [2/2] (short) (narrow) %v2140_v30, 32 }
 0x187   : > { %1250 = vxpose.xlu1.b32.end [2/2] (short) (narrow) %v2212_v31, 32 }
 0x18f   : > { %582 = vxpose.xlu0.b32.start [1/2] (short) (narrow) %v477_v36, 32  ;;  %v1764_v36 = vshrl.u32 %v1763_v29, 7 }
 0x190   : > { %1281 = vxpose.xlu1.b32.start [1/2] (short) (narrow) %v1176_v37, 32 }
 0x191   : > { %vm1766_vm2 = vcmp.eq.s32.totalorder %v1764_v36, 0 }
 0x193   : > { %583 = vxpose.xlu0.b32.end [2/2] (short) (narrow) %v2143_v34, 32 }
 0x194   : > { %1282 = vxpose.xlu1.b32.end [2/2] (short) (narrow) %v2215_v35, 32 }
 0x1e8   : > { %v2923_v42 = vpop.trf.xlu0 }
 0x1e9   : > { %v2921_v41 = vpop.trf.xlu1  ;;  %2148 = vmatprep.mubr.msk.f32.mxu1 %vm356_vm0, %v2923_v42 }
 0x1ea   : > { %2220 = vmatprep.mubr.msk.f32.mxu0 %vm356_vm0, %v2921_v41 }
 0x1ec   : > { %v2931_v44 = vpop.trf.xlu0 }
 0x1ed   : > { %v2929_v43 = vpop.trf.xlu1  ;;  %2149 = vmatmul.mubr.msk.f32.vlgmr.msra.gmra.mrb[8].mxu1 %vm356_vm0, %v2931_v44 }
 0x1ee   : > { %2221 = vmatmul.mubr.msk.f32.vlgmr.msra.gmra.mrb[8].mxu0 %vm356_vm0, %v2929_v43  ;;  %2283 = vmatpush3.bf16.msra.mxu1 %v2280_v40 }
 0x1ef   : > { %2295 = vmatpush3.bf16.msra.mxu0 %v2280_v40 }
 0x1f0   : > { %v504_v46 = vpop.trf.xlu0 }
 0x1f1   : > { %v1203_v45 = vpop.trf.xlu1  ;;  %2151 = vmatprep.mubr.msk.f32.mxu1 %vm356_vm0, %v504_v46 }
 0x1f2   : > { %2223 = vmatprep.mubr.msk.f32.mxu0 %vm356_vm0, %v1203_v45 }
 0x1f4   : > { %v505_v48 = vpop.trf.xlu0 }
 0x1f5   : > { %v1204_v47 = vpop.trf.xlu1  ;;  %2152 = vmatmul.mubr.msk.f32.gmra.mrb[10].mxu1 %vm356_vm0, %v505_v48 }
 0x1f6   : > { %2224 = vmatmul.mubr.msk.f32.gmra.mrb[10].mxu0 %vm356_vm0, %v1204_v47 }
 0x1f8   : > { %v534_v50 = vpop.trf.xlu0 }
 0x1f9   : > { %v1233_v49 = vpop.trf.xlu1  ;;  %2154 = vmatprep.mubr.msk.f32.mxu1 %vm356_vm0, %v534_v50 }
 0x1fa   : > { %2226 = vmatprep.mubr.msk.f32.mxu0 %vm356_vm0, %v1233_v49 }
 0x1fc   : > { %v535_v52 = vpop.trf.xlu0 }
 0x1fd   : > { %v1234_v51 = vpop.trf.xlu1  ;;  %2155 = vmatmul.mubr.msk.f32.gmra.mrb[12].mxu1 %vm356_vm0, %v535_v52 }
 0x1fe   : > { %2227 = vmatmul.mubr.msk.f32.gmra.mrb[12].mxu0 %vm356_vm0, %v1234_v51 }
 0x200   : > { %v536_v54 = vpop.trf.xlu0 }
 0x201   : > { %v1235_v53 = vpop.trf.xlu1  ;;  %2157 = vmatprep.mubr.msk.f32.mxu1 %vm356_vm0, %v536_v54 }
 0x202   : > { %2229 = vmatprep.mubr.msk.f32.mxu0 %vm356_vm0, %v1235_v53 }
 0x204   : > { %v537_v56 = vpop.trf.xlu0 }
 0x205   : > { %v1236_v55 = vpop.trf.xlu1  ;;  %2158 = vmatmul.mubr.msk.f32.gmra.mrb[14].mxu1 %vm356_vm0, %v537_v56 }
 0x206   : > { %2230 = vmatmul.mubr.msk.f32.gmra.mrb[14].mxu0 %vm356_vm0, %v1236_v55 }
 0x208   : > { %v566_v58 = vpop.trf.xlu0 }
 0x209   : > { %v1265_v57 = vpop.trf.xlu1  ;;  %2160 = vmatprep.mubr.msk.f32.mxu1 %vm356_vm0, %v566_v58 }
 0x20a   : > { %2232 = vmatprep.mubr.msk.f32.mxu0 %vm356_vm0, %v1265_v57 }
 0x20c   : > { %v567_v60 = vpop.trf.xlu0 }
 0x20d   : > { %v1266_v59 = vpop.trf.xlu1  ;;  %2161 = vmatmul.mubr.msk.f32.gmra.mrb[16].mxu1 %vm356_vm0, %v567_v60 }
 0x20e   : > { %2233 = vmatmul.mubr.msk.f32.gmra.mrb[16].mxu0 %vm356_vm0, %v1266_v59 }
 0x210   : > { %v568_v62 = vpop.trf.xlu0 }
 0x211   : > { %v1267_v61 = vpop.trf.xlu1  ;;  %2163 = vmatprep.mubr.msk.f32.mxu1 %vm356_vm0, %v568_v62 }
 0x212   : > { %2235 = vmatprep.mubr.msk.f32.mxu0 %vm356_vm0, %v1267_v61 }
 0x214   : > { %v569_v0 = vpop.trf.xlu0 }
 0x215   : > { %v1268_v63 = vpop.trf.xlu1  ;;  %2164 = vmatmul.mubr.msk.f32.gmra.mrb[18].mxu1 %vm356_vm0, %v569_v0 }
 0x216   : > { %2236 = vmatmul.mubr.msk.f32.gmra.mrb[18].mxu0 %vm356_vm0, %v1268_v63 }
 0x218   : > { %v598_v2 = vpop.trf.xlu0 }
 0x219   : > { %v1297_v1 = vpop.trf.xlu1  ;;  %2166 = vmatprep.mubr.msk.f32.mxu1 %vm356_vm0, %v598_v2 }
 0x21a   : > { %2238 = vmatprep.mubr.msk.f32.mxu0 %vm356_vm0, %v1297_v1 }
 0x21c   : > { %v599_v4 = vpop.trf.xlu0 }
 0x21d   : > { %v1298_v3 = vpop.trf.xlu1  ;;  %2167 = vmatmul.mubr.msk.f32.gmra.mrb[20].mxu1 %vm356_vm0, %v599_v4 }
 0x21e   : > { %2239 = vmatmul.mubr.msk.f32.gmra.mrb[20].mxu0 %vm356_vm0, %v1298_v3 }
 0x220   : > { %v600_v6 = vpop.trf.xlu0 }
 0x221   : > { %v1299_v5 = vpop.trf.xlu1  ;;  %2169 = vmatprep.mubr.msk.f32.mxu1 %vm356_vm0, %v600_v6 }
 0x222   : > { %2241 = vmatprep.mubr.msk.f32.mxu0 %vm356_vm0, %v1299_v5 }
 0x224   : > { %v601_v8 = vpop.trf.xlu0 }
 0x225   : > { %v1300_v7 = vpop.trf.xlu1  ;;  %2170 = vmatmul.mubr.msk.f32.gmra.mrb[22].mxu1 %vm356_vm0, %v601_v8 }
 0x226   : > { %2242 = vmatmul.mubr.msk.f32.gmra.mrb[22].mxu0 %vm356_vm0, %v1300_v7  ;;  %2176 = vmatprep.mubr.msk.f32.mxu1 %vm356_vm0, %v2923_v42 }
 0x227   : > { %2248 = vmatprep.mubr.msk.f32.mxu0 %vm356_vm0, %v2921_v41 }
 0x229   : > { %2177 = vmatmul.mubr.msk.f32.vlgmr.msra.gmra.mrb[10].mxu1 %vm356_vm0, %v2931_v44 }
 0x22a   : > { %2249 = vmatmul.mubr.msk.f32.vlgmr.msra.gmra.mrb[10].mxu0 %vm356_vm0, %v2929_v43  ;;  %2179 = vmatprep.mubr.msk.f32.mxu1 %vm356_vm0, %v504_v46 }
 0x22b   : > { %2251 = vmatprep.mubr.msk.f32.mxu0 %vm356_vm0, %v1203_v45 }
 0x22d   : > { %2180 = vmatmul.mubr.msk.f32.gmra.mrb[24].mxu1 %vm356_vm0, %v505_v48 }
 0x22e   : > { %2252 = vmatmul.mubr.msk.f32.gmra.mrb[24].mxu0 %vm356_vm0, %v1204_v47  ;;  %2182 = vmatprep.mubr.msk.f32.mxu1 %vm356_vm0, %v534_v50 }
 0x22f   : > { %2254 = vmatprep.mubr.msk.f32.mxu0 %vm356_vm0, %v1233_v49 }
 0x231   : > { %2183 = vmatmul.mubr.msk.f32.gmra.mrb[14].mxu1 %vm356_vm0, %v535_v52 }
 0x232   : > { %2255 = vmatmul.mubr.msk.f32.gmra.mrb[14].mxu0 %vm356_vm0, %v1234_v51  ;;  %2185 = vmatprep.mubr.msk.f32.mxu1 %vm356_vm0, %v536_v54 }
 0x233   : > { %2257 = vmatprep.mubr.msk.f32.mxu0 %vm356_vm0, %v1235_v53  ;;  %v1765_v53 = vadd.s32 8, %v1764_v36 }
 0x235   : > { %2186 = vmatmul.mubr.msk.f32.gmra.mrb[26].mxu1 %vm356_vm0, %v537_v56  ;;  %vm1771_vm1 = vcmp.eq.s32.totalorder %v1765_v53, 8 }
 0x236   : > { %2258 = vmatmul.mubr.msk.f32.gmra.mrb[26].mxu0 %vm356_vm0, %v1236_v55  ;;  %2188 = vmatprep.mubr.msk.f32.mxu1 %vm356_vm0, %v566_v58 }
 0x237   : > { %2260 = vmatprep.mubr.msk.f32.mxu0 %vm356_vm0, %v1265_v57 }
 0x239   : > { %2189 = vmatmul.mubr.msk.f32.gmra.mrb[18].mxu1 %vm356_vm0, %v567_v60 }
 0x23a   : > { %2261 = vmatmul.mubr.msk.f32.gmra.mrb[18].mxu0 %vm356_vm0, %v1266_v59  ;;  %2191 = vmatprep.mubr.msk.f32.mxu1 %vm356_vm0, %v568_v62 }
 0x23b   : > { %2263 = vmatprep.mubr.msk.f32.mxu0 %vm356_vm0, %v1267_v61 }
 0x23d   : > { %2192 = vmatmul.mubr.msk.f32.gmra.mrb[28].mxu1 %vm356_vm0, %v569_v0 }
 0x23e   : > { %2264 = vmatmul.mubr.msk.f32.gmra.mrb[28].mxu0 %vm356_vm0, %v1268_v63  ;;  %2194 = vmatprep.mubr.msk.f32.mxu1 %vm356_vm0, %v598_v2 }
 0x23f   : > { %2266 = vmatprep.mubr.msk.f32.mxu0 %vm356_vm0, %v1297_v1 }
 0x241   : > { %2195 = vmatmul.mubr.msk.f32.gmra.mrb[22].mxu1 %vm356_vm0, %v599_v4 }
 0x242   : > { %2267 = vmatmul.mubr.msk.f32.gmra.mrb[22].mxu0 %vm356_vm0, %v1298_v3  ;;  %2197 = vmatprep.mubr.msk.f32.mxu1 %vm356_vm0, %v600_v6 }
 0x243   : > { %2269 = vmatprep.mubr.msk.f32.mxu0 %vm356_vm0, %v1299_v5 }
 0x245   : > { %2198 = vmatmul.mubr.msk.f32.gmra.mrb[30].mxu1 %vm356_vm0, %v601_v8 }
 0x246   : > { %2270 = vmatmul.mubr.msk.f32.gmra.mrb[30].mxu0 %vm356_vm0, %v1300_v7 }
 0x2c0   : > { %v2150_v9 = vpop.f32.mrb[8].mxu1 }
 0x2c1   : > { %v2222_v10 = vpop.f32.mrb[8].mxu0  ;;  %v728_v11 = vpop.f32.mrb[9].mxu1 }
 0x2c2   : > { %v1427_v12 = vpop.f32.mrb[9].mxu0 }
 0x2d0   : > { %v2156_v13 = vpop.f32.mrb[12].mxu1 }
 0x2d1   : > { %v2228_v14 = vpop.f32.mrb[12].mxu0  ;;  %v748_v15 = vpop.f32.mrb[13].mxu1 }
 0x2d2   : > { %v1447_v16 = vpop.f32.mrb[13].mxu0 }
 0x2e0   : > { %v3001_v17 = vpop.f32.mrb[16].mxu1 }
 0x2e1   : > { %v3003_v18 = vpop.f32.mrb[16].mxu0  ;;  %v3005_v19 = vpop.f32.mrb[17].mxu1 }
 0x2e2   : > { %v3007_v20 = vpop.f32.mrb[17].mxu0 }
 0x2f0   : > { %v3009_v21 = vpop.f32.mrb[20].mxu1 }
 0x2f1   : > { %v3011_v22 = vpop.f32.mrb[20].mxu0  ;;  %v3013_v23 = vpop.f32.mrb[21].mxu1 }
 0x2f2   : > { %v3015_v24 = vpop.f32.mrb[21].mxu0 }
 0x2fc   : > { %v2178_v25 = vpop.f32.mrb[10].mxu1 }
 0x2fd   : > { %v2250_v26 = vpop.f32.mrb[10].mxu0  ;;  %v873_v27 = vpop.f32.mrb[11].mxu1  ;;  %v977_v39 = vmul.f32 %v2178_v25, %v2178_v25 }
 0x2fe   : > { %v1572_v28 = vpop.f32.mrb[11].mxu0  ;;  %v1676_v40 = vmul.f32 %v2250_v26, %v2250_v26  ;;  %v976_v43 = vmul.f32 %v873_v27, %v873_v27 }
 0x2ff   : > { %v1675_v44 = vmul.f32 %v1572_v28, %v1572_v28 }
 0x300   : > { %v2181_v30 = vpop.f32.mrb[24].mxu1 }
 0x301   : > { %v2253_v31 = vpop.f32.mrb[24].mxu0  ;;  %v953_v32 = vsub.f32 %v2150_v9, %v2181_v30  ;;  %v883_v34 = vpop.f32.mrb[25].mxu1 }
 0x302   : > { %v1652_v33 = vsub.f32 %v2222_v10, %v2253_v31  ;;  %v1582_v35 = vpop.f32.mrb[25].mxu0  ;;  %v952_v37 = vsub.f32 %v728_v11, %v883_v34 }
 0x303   : > { %v1651_v38 = vsub.f32 %v1427_v12, %v1582_v35  ;;  %v969_v41 = vmul.f32 %v953_v32, %v953_v32 }
 0x304   : > { %v1668_v42 = vmul.f32 %v1652_v33, %v1652_v33  ;;  %v968_v45 = vmul.f32 %v952_v37, %v952_v37  ;;  %v2184_v47 = vpop.f32.mrb[14].mxu1 }
 0x305   : > { %v1667_v46 = vmul.f32 %v1651_v38, %v1651_v38  ;;  %v2256_v48 = vpop.f32.mrb[14].mxu0  ;;  %v3017_v49 = vadd.f32 %v977_v39, %v969_v41  ;;  %v893_v51 = vpop.f32.mrb[15].mxu1  ;;  %v979_v0 = vmul.f32 %v2184_v47, %v2184_v47 }
 0x306   : > { %v3019_v50 = vadd.f32 %v1676_v40, %v1668_v42  ;;  %v1592_v52 = vpop.f32.mrb[15].mxu0  ;;  %v3021_v54 = vadd.f32 %v976_v43, %v968_v45  ;;  %v1678_v1 = vmul.f32 %v2256_v48, %v2256_v48  ;;  %v978_v4 = vmul.f32 %v893_v51, %v893_v51 }
 0x307   : > { %v3023_v55 = vadd.f32 %v1675_v44, %v1667_v46  ;;  %2399 = vrsqrt.f32 %v3017_v49  ;;  %v1677_v5 = vmul.f32 %v1592_v52, %v1592_v52  ;;  %vm1001_vm3 = vcmp.eq.f32.partialorder %v3017_v49, inf }
 0x308   : > { %2401 = vrsqrt.f32 %v3019_v50  ;;  %v2187_v56 = vpop.f32.mrb[26].mxu1  ;;  %v1004_v27 = vand.u32 2147483648, %v3017_v49  ;;  %vm994_vm4 = vcmp.eq.f32.partialorder %v3021_v54, inf  ;;  %v997_v28 = vand.u32 2147483648, %v3021_v54 }
 0x309   : > { %v2259_v57 = vpop.f32.mrb[26].mxu0  ;;  %2403 = vrsqrt.f32 %v3021_v54  ;;  %v955_v58 = vsub.f32 %v2156_v13, %v2187_v56  ;;  %v903_v60 = vpop.f32.mrb[27].mxu1  ;;  %v1696_v29 = vand.u32 2147483648, %v3023_v55  ;;  %v1703_v34 = vand.u32 2147483648, %v3019_v50 }
 0x30a   : > { %v1654_v59 = vsub.f32 %v2228_v14, %v2259_v57  ;;  %v1602_v61 = vpop.f32.mrb[27].mxu0  ;;  %2405 = vrsqrt.f32 %v3023_v55  ;;  %v954_v62 = vsub.f32 %v748_v15, %v903_v60  ;;  %v2617_v14 = vmov 2.0  }
 0x30b   : > { %v1653_v63 = vsub.f32 %v1447_v16, %v1602_v61  ;;  %v971_v2 = vmul.f32 %v955_v58, %v955_v58  ;;  %v3034_v15 = vsel %vm1766_vm2, 1.0, %v2617_v14  ;;  %v3037_v16 = vsel %vm1771_vm1, 1.0, %v2617_v14 }
 0x30c   : > { %v1670_v3 = vmul.f32 %v1654_v59, %v1654_v59  ;;  %v970_v6 = vmul.f32 %v954_v62, %v954_v62  ;;  %v2190_v8 = vpop.f32.mrb[18].mxu1  ;;  %vm996_vm5 = vcmp.eq.f32.partialorder %v3021_v54, 0.0  ;;  %vm1003_vm6 = vcmp.eq.f32.partialorder %v3017_v49, 0.0 }
 0x30d   : > { %v1669_v7 = vmul.f32 %v1653_v63, %v1653_v63  ;;  %v2262_v9 = vpop.f32.mrb[18].mxu0  ;;  %v3029_v10 = vadd.f32 %v979_v0, %v971_v2  ;;  %v913_v12 = vpop.f32.mrb[19].mxu1  ;;  %v981_v30 = vmul.f32 %v2190_v8, %v2190_v8  ;;  %vm1693_vm11 = vcmp.eq.f32.partialorder %v3023_v55, inf }
 0x30e   : > { %v3031_v11 = vadd.f32 %v1678_v1, %v1670_v3  ;;  %v1612_v13 = vpop.f32.mrb[19].mxu0  ;;  %v3039_v25 = vadd.f32 %v978_v4, %v970_v6  ;;  %v1680_v31 = vmul.f32 %v2262_v9, %v2262_v9  ;;  %v980_v36 = vmul.f32 %v913_v12, %v913_v12 }
 0x30f   : > { %v3041_v26 = vadd.f32 %v1677_v5, %v1669_v7  ;;  %2407 = vrsqrt.f32 %v3029_v10  ;;  %v1679_v42 = vmul.f32 %v1612_v13, %v1612_v13  ;;  %vm1015_vm7 = vcmp.eq.f32.partialorder %v3029_v10, inf }
 0x310   : > { %2409 = vrsqrt.f32 %v3031_v11  ;;  %v2193_v32 = vpop.f32.mrb[28].mxu1  ;;  %vm1008_vm8 = vcmp.eq.f32.partialorder %v3039_v25, inf  ;;  %v1011_v56 = vand.u32 2147483648, %v3039_v25  ;;  %vm1017_vm9 = vcmp.eq.f32.partialorder %v3029_v10, 0.0 }
 0x311   : > { %v2265_v33 = vpop.f32.mrb[28].mxu0  ;;  %v2400_v35 = vpop.eup %2399  ;;  %2411 = vrsqrt.f32 %v3039_v25  ;;  %v957_v37 = vsub.f32 %v3001_v17, %v2193_v32  ;;  %v1710_v62 = vand.u32 2147483648, %v3041_v26  ;;  %vm1010_vm10 = vcmp.eq.f32.partialorder %v3039_v25, 0.0 }
 0x312   : > { %v1656_v38 = vsub.f32 %v3003_v18, %v2265_v33  ;;  %v923_v39 = vpop.f32.mrb[29].mxu1  ;;  %v1622_v40 = vpop.f32.mrb[29].mxu0  ;;  %2413 = vrsqrt.f32 %v3041_v26  ;;  %v1000_v46 = vmul.f32 %v2400_v35, %v3017_v49  ;;  %vm1695_vm12 = vcmp.eq.f32.partialorder %v3023_v55, 0.0 }
 0x313   : > { %v2402_v41 = vpop.eup %2401  ;;  %v956_v43 = vsub.f32 %v3005_v19, %v923_v39  ;;  %v1655_v44 = vsub.f32 %v3007_v20, %v1622_v40  ;;  %v973_v17 = vmul.f32 %v957_v37, %v957_v37  ;;  %v1018_v20 = vand.u32 2147483648, %v3029_v10 }
 0x314   : > { %v2404_v45 = vpop.eup %2403  ;;  %v1672_v47 = vmul.f32 %v1656_v38, %v1656_v38  ;;  %v2196_v53 = vpop.f32.mrb[22].mxu1  ;;  %v3070_v61 = vmul.f32 %v2402_v41, %v3019_v50  ;;  %v1002_v3 = vsel %vm1001_vm3, %v3017_v49, %v1000_v46  ;;  %vm1700_vm13 = vcmp.eq.f32.partialorder %v3019_v50, inf }
 0x315   : > { %v2406_v18 = vpop.eup %2405  ;;  %v993_v48 = vmul.f32 %v2404_v45, %v3021_v54  ;;  %v972_v51 = vmul.f32 %v956_v43, %v956_v43  ;;  %v1671_v52 = vmul.f32 %v1655_v44, %v1655_v44  ;;  %v2268_v19 = vpop.f32.mrb[22].mxu0  ;;  %v3065_v57 = vadd.f32 %v981_v30, %v973_v17 }
 0x316   : > { %v3067_v58 = vadd.f32 %v1680_v31, %v1672_v47  ;;  %v933_v59 = vpop.f32.mrb[23].mxu1  ;;  %v1632_v60 = vpop.f32.mrb[23].mxu0  ;;  %v1692_v1 = vmul.f32 %v2406_v18, %v3023_v55  ;;  %v983_v2 = vmul.f32 %v2196_v53, %v2196_v53  ;;  %v1682_v4 = vmul.f32 %v2268_v19, %v2268_v19 }
 0x317   : > { %v3073_v63 = vadd.f32 %v980_v36, %v972_v51  ;;  %v3075_v0 = vadd.f32 %v1679_v42, %v1671_v52  ;;  %2415 = vrsqrt.f32 %v3065_v57  ;;  %v982_v5 = vmul.f32 %v933_v59, %v933_v59 }
 0x318   : > { %2417 = vrsqrt.f32 %v3067_v58  ;;  %v2199_v6 = vpop.f32.mrb[30].mxu1  ;;  %v995_v8 = vsel %vm994_vm4, %v3021_v54, %v993_v48  ;;  %v1681_v12 = vmul.f32 %v1632_v60, %v1632_v60  ;;  %vm1707_vm14 = vcmp.eq.f32.partialorder %v3041_v26, inf }
 0x319   : > { %v2271_v7 = vpop.f32.mrb[30].mxu0  ;;  %v2408_v9 = vpop.eup %2407  ;;  %2419 = vrsqrt.f32 %v3073_v63  ;;  %v959_v13 = vsub.f32 %v3009_v21, %v2199_v6  ;;  %vm1702_vm15 = vcmp.eq.f32.partialorder %v3019_v50, 0.0  ;;  %v3104_v38 = vsel %vm996_vm5, %v997_v28, %v995_v8 }
 0x31a   : > { %v1658_v14 = vsub.f32 %v3011_v22, %v2271_v7  ;;  %v943_v30 = vpop.f32.mrb[31].mxu1  ;;  %v1642_v31 = vpop.f32.mrb[31].mxu0  ;;  %v1014_v33 = vmul.f32 %v2408_v9, %v3029_v10  ;;  %2421 = vrsqrt.f32 %v3075_v0  ;;  %v3110_v39 = vsel %vm1003_vm6, %v1004_v27, %v1002_v3 }
 0x31b   : > { %v2410_v32 = vpop.eup %2409  ;;  %v958_v35 = vsub.f32 %v3013_v23, %v943_v30  ;;  %v1657_v36 = vsub.f32 %v3015_v24, %v1642_v31  ;;  %v975_v22 = vmul.f32 %v959_v13, %v959_v13  ;;  %vm1022_vm1 = vcmp.eq.f32.partialorder %v3073_v63, inf }
 0x31c   : > { %v2412_v21 = vpop.eup %2411  ;;  %v1674_v37 = vmul.f32 %v1658_v14, %v1658_v14  ;;  %v1016_v42 = vsel %vm1015_vm7, %v3029_v10, %v1014_v33  ;;  %v1025_v28 = vand.u32 2147483648, %v3073_v63  ;;  %v1713_v49 = vmul.f32 %v2410_v32, %v3031_v11 }
 0x31d   : > { %v2414_v23 = vpop.eup %2413  ;;  %v1007_v24 = vmul.f32 %v2412_v21, %v3039_v25  ;;  %v974_v40 = vmul.f32 %v958_v35, %v958_v35  ;;  %v1673_v41 = vmul.f32 %v1657_v36, %v1657_v36  ;;  %v3116_v43 = vadd.f32 %v983_v2, %v975_v22 }
 0x31e   : > { %v3118_v54 = vadd.f32 %v1682_v4, %v1674_v37  ;;  %vm1024_vm2 = vcmp.eq.f32.partialorder %v3073_v63, 0.0  ;;  %v1706_v46 = vmul.f32 %v2414_v23, %v3041_v26  ;;  %v3135_v17 = vsel %vm1017_vm9, %v1018_v20, %v1016_v42 }
 0x31f   : > { %v3123_v27 = vadd.f32 %v982_v5, %v974_v40  ;;  %v3125_v44 = vadd.f32 %v1681_v12, %v1673_v41  ;;  %v1009_v45 = vsel %vm1008_vm8, %v3039_v25, %v1007_v24  ;;  %2423 = vrsqrt.f32 %v3116_v43 }
 0x320   : > { %vm1029_vm3 = vcmp.eq.f32.partialorder %v3065_v57, inf  ;;  %2425 = vrsqrt.f32 %v3118_v54  ;;  %v3143_v47 = vsel %vm1010_vm10, %v1011_v56, %v1009_v45  ;;  %vm1031_vm4 = vcmp.eq.f32.partialorder %v3065_v57, 0.0 }
 0x321   : > { %v1032_v18 = vand.u32 2147483648, %v3065_v57  ;;  %v2416_v48 = vpop.eup %2415  ;;  %2427 = vrsqrt.f32 %v3123_v27  ;;  %v1039_v10 = vand.u32 2147483648, %v3123_v27  ;;  %v1046_v51 = vand.u32 2147483648, %v3116_v43 }
 0x322   : > { %v1694_v52 = vsel %vm1693_vm11, %v3023_v55, %v1692_v1  ;;  %v2418_v53 = vpop.eup %2417  ;;  %2429 = vrsqrt.f32 %v3125_v44  ;;  %v1028_v25 = vmul.f32 %v2416_v48, %v3065_v57  ;;  %v1701_v20 = vsel %vm1700_vm13, %v3019_v50, %v3070_v61 }
 0x323   : > { %v1697_v19 = vsel %vm1695_vm12, %v1696_v29, %v1694_v52  ;;  %v2420_v56 = vpop.eup %2419  ;;  %vm1043_vm5 = vcmp.eq.f32.partialorder %v3116_v43, inf  ;;  %v1704_v59 = vsel %vm1702_vm15, %v1703_v34, %v1701_v20  ;;  %v1708_v60 = vsel %vm1707_vm14, %v3041_v26, %v1706_v46 }
 0x324   : > { %vm1709_vm6 = vcmp.eq.f32.partialorder %v3041_v26, 0.0  ;;  %vm1714_vm7 = vcmp.eq.f32.partialorder %v3031_v11, inf  ;;  %v2422_v55 = vpop.eup %2421  ;;  %v1021_v29 = vmul.f32 %v2420_v56, %v3073_v63  ;;  %v1030_v61 = vsel %vm1029_vm3, %v3065_v57, %v1028_v25 }
 0x325   : > { %vm1045_vm8 = vcmp.eq.f32.partialorder %v3116_v43, 0.0  ;;  %v1711_v50 = vsel %vm1709_vm6, %v1710_v62, %v1708_v60  ;;  %v1715_v34 = vsel %vm1714_vm7, %v3031_v11, %v1713_v49  ;;  %v1033_v1 = vsel %vm1031_vm4, %v1032_v18, %v1030_v61 }
 0x326   : > { %vm1036_vm9 = vcmp.eq.f32.partialorder %v3123_v27, inf  ;;  %vm1716_vm10 = vcmp.eq.f32.partialorder %v3031_v11, 0.0  ;;  %v1717_v2 = vand.u32 2147483648, %v3031_v11  ;;  %v1720_v3 = vmul.f32 %v2422_v55, %v3075_v0 }
 0x327   : > { %v1023_v4 = vsel %vm1022_vm1, %v3073_v63, %v1021_v29  ;;  %vm1038_vm11 = vcmp.eq.f32.partialorder %v3123_v27, 0.0  ;;  %vm1721_vm12 = vcmp.eq.f32.partialorder %v3075_v0, inf  ;;  %vm1723_vm13 = vcmp.eq.f32.partialorder %v3075_v0, 0.0 }
 0x328   : > { %v1724_v26 = vand.u32 2147483648, %v3075_v0  ;;  %v1026_v57 = vsel %vm1024_vm2, %v1025_v28, %v1023_v4  ;;  %v1718_v62 = vsel %vm1716_vm10, %v1717_v2, %v1715_v34  ;;  %v1722_v11 = vsel %vm1721_vm12, %v3075_v0, %v1720_v3 }
 0x329   : > { %v1727_v5 = vmul.f32 %v2418_v53, %v3067_v58  ;;  %vm1728_vm14 = vcmp.eq.f32.partialorder %v3067_v58, inf  ;;  %vm1730_vm15 = vcmp.eq.f32.partialorder %v3067_v58, 0.0  ;;  %v1731_v7 = vand.u32 2147483648, %v3067_v58  ;;  %v2424_v8 = vpop.eup %2423 }
 0x32a   : > { %v1725_v6 = vsel %vm1723_vm13, %v1724_v26, %v1722_v11  ;;  %vm1735_vm1 = vcmp.eq.f32.partialorder %v3125_v44, inf  ;;  %vm1737_vm3 = vcmp.eq.f32.partialorder %v3125_v44, 0.0  ;;  %v1738_v63 = vand.u32 2147483648, %v3125_v44  ;;  %v2426_v12 = vpop.eup %2425 }
 0x32b   : > { %v1729_v9 = vsel %vm1728_vm14, %v3067_v58, %v1727_v5  ;;  %v1042_v0 = vmul.f32 %v2424_v8, %v3116_v43  ;;  %vm1742_vm2 = vcmp.eq.f32.partialorder %v3118_v54, inf  ;;  %vm1744_vm4 = vcmp.eq.f32.partialorder %v3118_v54, 0.0  ;;  %v2428_v14 = vpop.eup %2427 }
 0x32c   : > { %v1732_v13 = vsel %vm1730_vm15, %v1731_v7, %v1729_v9  ;;  %v1741_v30 = vmul.f32 %v2426_v12, %v3118_v54  ;;  %v1745_v31 = vand.u32 2147483648, %v3118_v54  ;;  %v1747_v58 = vsub.f32 %v3104_v38, %v1697_v19  ;;  %v2430_v33 = vpop.eup %2429 }
 0x32d   : > { %v1748_v32 = vsub.f32 %v3110_v39, %v1704_v59  ;;  %v1035_v35 = vmul.f32 %v2428_v14, %v3123_v27  ;;  %v1044_v36 = vsel %vm1043_vm5, %v3116_v43, %v1042_v0  ;;  %v1749_v21 = vsub.f32 %v3143_v47, %v1711_v50 }
 0x32e   : > { %v1750_v22 = vsub.f32 %v3135_v17, %v1718_v62  ;;  %v1047_v37 = vsel %vm1045_vm8, %v1046_v51, %v1044_v36  ;;  %v1734_v23 = vmul.f32 %v2430_v33, %v3125_v44  ;;  %v1743_v38 = vsel %vm1742_vm2, %v3118_v54, %v1741_v30 }
 0x32f   : > { %v1751_v24 = vsub.f32 %v1026_v57, %v1725_v6  ;;  %v1037_v39 = vsel %vm1036_vm9, %v3123_v27, %v1035_v35  ;;  %v1746_v40 = vsel %vm1744_vm4, %v1745_v31, %v1743_v38  ;;  %v1752_v41 = vsub.f32 %v1033_v1, %v1732_v13 }
 0x330   : > { %v1755_v42 = vand.u32 2147483647, %v1747_v58  ;;  %v1040_v43 = vsel %vm1038_vm11, %v1039_v10, %v1037_v39  ;;  %v1736_v28 = vsel %vm1735_vm1, %v3125_v44, %v1734_v23  ;;  %v1754_v49 = vsub.f32 %v1047_v37, %v1746_v40 }
 0x331   : > { %v1756_v45 = vand.u32 2147483647, %v1748_v32  ;;  %v1739_v46 = vsel %vm1737_vm3, %v1738_v63, %v1736_v28  ;;  %v1757_v17 = vand.u32 2147483647, %v1749_v21  ;;  %v1758_v47 = vand.u32 2147483647, %v1750_v22 }
 0x332   : > { %v1759_v54 = vand.u32 2147483647, %v1751_v24  ;;  %v1753_v18 = vsub.f32 %v1040_v43, %v1739_v46  ;;  %v1774_v48 = vmul.f32 %v3034_v15, %v1755_v42  ;;  %v1760_v10 = vand.u32 2147483647, %v1752_v41 }
 0x333   : > { %v1775_v51 = vmul.f32 %v3037_v16, %v1756_v45  ;;  %v1776_v27 = vmul.f32 %v3034_v15, %v1757_v17  ;;  %v1777_v52 = vmul.f32 %v3037_v16, %v1758_v47  ;;  %v1762_v59 = vand.u32 2147483647, %v1754_v49 }
 0x334   : > { %v1782_v53 = vsel %vm356_vm0, %v1774_v48, 0.0  ;;  %v1761_v25 = vand.u32 2147483647, %v1753_v18  ;;  %v1778_v19 = vmul.f32 %v3034_v15, %v1759_v54  ;;  %v1779_v55 = vmul.f32 %v3037_v16, %v1760_v10 }
 0x335   : > { %v1783_v44 = vsel %vm356_vm0, %v1775_v51, 0.0  ;;  %v1785_v20 = vsel %vm356_vm0, %v1776_v27, 0.0  ;;  %v1787_v61 = vsel %vm356_vm0, %v1777_v52, 0.0  ;;  %v1781_v2 = vmul.f32 %v3037_v16, %v1762_v59 }
 0x336   : > { %v1784_v56 = vadd.f32 %v1783_v44, %v1782_v53  ;;  %v1780_v29 = vmul.f32 %v3034_v15, %v1761_v25  ;;  %v1789_v50 = vsel %vm356_vm0, %v1778_v19, 0.0  ;;  %v1791_v3 = vsel %vm356_vm0, %v1779_v55, 0.0 }
 0x337   : > { %v1795_v62 = vsel %vm356_vm0, %v1781_v2, 0.0  ;;  %vm1808_vm5 = vcmask 0  }
 0x338   : > { %v1786_v60 = vadd.f32 %v1785_v20, %v1784_v56  ;;  %v1793_v4 = vsel %vm356_vm0, %v1780_v29, 0.0 }
 0x33a   : > { %v1788_v34 = vadd.f32 %v1787_v61, %v1786_v60 }
 0x33c   : > { %v1790_v1 = vadd.f32 %v1789_v50, %v1788_v34 }
 0x33e   : > { %v1792_v26 = vadd.f32 %v1791_v3, %v1790_v1 }
 0x340   : > { %v1794_v57 = vadd.f32 %v1793_v4, %v1792_v26 }
 0x342   : > { %v1796_v11 = vadd.f32 %v1795_v62, %v1794_v57 }
 0x344   : > { %1797 = vadd.xlane.f32.xlu0 %v1796_v11 }
 0x3d1   : > { %v1798_v15 = vpop.xlane.xlu0 %1797 }
 0x3d2   : > { %v1799_v5 = vrot.slane %v1798_v15, 4 }
 0x3d4   : > { %v1800_v6 = vadd.f32 %v1799_v5, %v1798_v15 }
 0x3d6   : > { %v1801_v7 = vrot.slane %v1800_v6, 2 }
 0x3d8   : > { %v1802_v8 = vadd.f32 %v1801_v7, %v1800_v6 }
 0x3da   : > { %v1803_v9 = vrot.slane %v1802_v8, 1 }
 0x3dc   : > { %v1804_v63 = vadd.f32 %v1803_v9, %v1802_v8 }
 0x3de   : > { %2312 = vpush %v1804_v63 }
 0x40f   : > { %s2313_s24 = spop %2312 }
 0x410   : > { %v1806_v16 = vstv %s2313_s24 }
 0x411   : > { %1809 = vst.msk [vmem:[%s341_s8] sm:$0x1] %vm1808_vm5, %v1806_v16 }
 0x412 PF: > { %s22_s23 = sadd.s32 1, %s2609_s23   ;;  %s3303_s12 = smov %s3310_s18 }
 0x413   : > { %p19_p8 = scmp.ge.s32.totalorder %s22_s23, 4   ;;  %s3304_s18 = smov %s2593_s19 }
 0x414   : > { %s3305_s19 = smov %s2597_s20  ;;  %s3306_s20 = smov %s2772_s10 }
 0x415   : > { %s3307_s21 = smov %s2605_s22  ;;  %s3308_s22 = smov %s3303_s12 }
 0x416   :  { %21 = sbr.rel (!%p19_p8) target bundleno = 9 (0x9), region = 101 }
 0x41d   :  { %1833 = vsyncpa [#allocation3], 1 }
 0x41e   :  { %1835 = vsyncpa [#allocation3 + $0x1], 1 }
 0x41f   :  { %1836 = vsyncpa [#allocation5], 1 }
 0x420   :  { %1838 = vsyncpa [#allocation5 + $0x1], 1 }
 0x421   :  { %1839 = vsyncpa [#allocation8], 1 }

</bundles_post_ra>
